<compile_context>
chip_gen: v7x
topology: tpu7x:2x2x1
jax: 0.10.0
libtpu: 0.0.40
codegen_flags: <defaults>
</compile_context>

<pallas_src>
import jax
import jax.numpy as jnp
from jax.experimental import pallas as pl
from jax.experimental.pallas import tpu as pltpu

BIG_ISSUES_N = 48
USEFUL_CATS_N = 6
CAT_DIM = USEFUL_CATS_N * 10 + BIG_ISSUES_N * 10 + 2   # 542
ISSUE_DIM = 10
CAT_REP = 64
ISSUE_REP = 10
HIDDEN = 200
OUT = 2
OUT_PAD = 8        # small lane pad; block last-dim == full array dim (legal)
MAX_TILE = 1024    # batch-tile cap: big contiguous DMAs, fits default scoped VMEM


def _round_up(x, m):
    return (x + m - 1) // m * m


# ----------------------------------------------------------------------------
# Parameters
# ----------------------------------------------------------------------------
def init_params(key):
    """PyTorch-nn.Linear-style init. Weights stored (in_features, out_features)."""
    def linear(k, fan_in, fan_out):
        kw, kb = jax.random.split(k)
        bound = 1.0 / jnp.sqrt(fan_in)
        w = jax.random.uniform(kw, (fan_in, fan_out), jnp.float32, -bound, bound)
        b = jax.random.uniform(kb, (fan_out,), jnp.float32, -bound, bound)
        return w, b

    ks = jax.random.split(key, 5)
    wc, bc = linear(ks[0], CAT_DIM, CAT_REP)                  # cat_specific
    wi, bi = linear(ks[1], ISSUE_DIM, ISSUE_REP)              # issue_specific
    wcls, bcls = linear(ks[2], CAT_REP + ISSUE_REP, HIDDEN)   # classification
    w2, b2 = linear(ks[3], HIDDEN, HIDDEN)                    # second_last_layer
    w3, b3 = linear(ks[4], HIDDEN, OUT)                       # last_layer
    return (wc, bc, wi, bi, wcls, bcls, w2, b2, w3, b3)


def prepare_params(params):
    """One-time fold of the purely-affine chain (exact up to fp32 rounding).

    concat([cat_rep, issue_rep]) @ Wcls == cat_rep @ Wcls[:64] + issue_rep @ Wcls[64:]
    so the composition of the 5 Linear layers is a single affine map:
        out = cat @ W_cat_eff + issue @ W_iss_eff + b_eff
    """
    wc, bc, wi, bi, wcls, bcls, w2, b2, w3, b3 = params
    wcls_cat = wcls[:CAT_REP]          # (64, 200)
    wcls_iss = wcls[CAT_REP:]          # (10, 200)
    w23 = w2 @ w3                      # (200, 2)

    w_cat_eff = wc @ (wcls_cat @ w23)  # (542, 2)
    w_iss_eff = wi @ (wcls_iss @ w23)  # (10, 2)
    b_eff = ((bc @ wcls_cat + bi @ wcls_iss + bcls) @ w2 + b2) @ w3 + b3   # (2,)

    # Pad output lanes 2 -> 8 only (was 128): weight DMA / output writeback ~16x less.
    w_cat_p = jnp.zeros((CAT_DIM, OUT_PAD), jnp.float32).at[:, :OUT].set(w_cat_eff)
    w_iss_p = jnp.zeros((ISSUE_DIM, OUT_PAD), jnp.float32).at[:, :OUT].set(w_iss_eff)
    b_p = jnp.zeros((1, OUT_PAD), jnp.float32).at[0, :OUT].set(b_eff)

    return {
        "padded": (w_cat_p, w_iss_p, b_p),            # for the Pallas batched path
        "folded": (w_cat_eff, w_iss_eff, b_eff),       # for the B=1 plain-XLA path
    }


# ----------------------------------------------------------------------------
# Pallas kernel (batched path)
# ----------------------------------------------------------------------------
def remove_argument_kernel(xc_ref, xi_ref, wc_ref, wi_ref, b_ref, out_ref):
    # (tb, 542) @ (542, 8)  +  (tb, 10) @ (10, 8)  +  bias
    out_ref[...] = (
        jnp.dot(xc_ref[...], wc_ref[...], preferred_element_type=jnp.float32)
        + jnp.dot(xi_ref[...], wi_ref[...], preferred_element_type=jnp.float32)
        + b_ref[...]
    )


def _pick_tile(B):
    """Batch tile: sublane-aligned, >=2 grid steps when possible (v7x 2-TC),
    capped at MAX_TILE rows for DMA efficiency within default scoped VMEM."""
    if B <= 8:
        return 8
    return max(8, min(MAX_TILE, _round_up(pl.cdiv(B, 2), 8)))


def _batched_call(cat, issue, prepared):
    """cat: (B, 542), issue: (B, 10) -> (B, 2).  No wrapper-side padding:
    the ragged last block is handled by Pallas partial-block masking."""
    w_cat_p, w_iss_p, b_p = prepared["padded"]
    B = cat.shape[0]
    tb = _pick_tile(B)

    out = pl.pallas_call(
        remove_argument_kernel,
        out_shape=jax.ShapeDtypeStruct((B, OUT_PAD), jnp.float32),
        grid=(pl.cdiv(B, tb),),
        in_specs=[
            pl.BlockSpec((tb, CAT_DIM), lambda i: (i, 0)),        # batch-tiled input
            pl.BlockSpec((tb, ISSUE_DIM), lambda i: (i, 0)),      # batch-tiled input
            pl.BlockSpec((CAT_DIM, OUT_PAD), lambda i: (0, 0)),   # resident weight
            pl.BlockSpec((ISSUE_DIM, OUT_PAD), lambda i: (0, 0)), # resident weight
            pl.BlockSpec((1, OUT_PAD), lambda i: (0, 0)),         # resident bias
        ],
        out_specs=pl.BlockSpec((tb, OUT_PAD), lambda i: (i, 0)),
        compiler_params=pltpu.CompilerParams(
            dimension_semantics=("parallel",)),    # shard batch across TCs on v7x
    )(cat, issue, w_cat_p, w_iss_p, b_p)

    return out[:, :OUT]


def _single_call(cat, issue, prepared):
    """B=1 latency path: the folded affine map is ~1.1K MACs; a fused XLA dot
    is strictly cheaper than a pallas_call dispatch + weight DMA."""
    w_cat_eff, w_iss_eff, b_eff = prepared["folded"]
    return cat @ w_cat_eff + issue @ w_iss_eff + b_eff


def remove_argument_forward(cat_vec, ling_vec, tokenized_sents1, tokenized_sents2,
                            issue_emb, prepared_params):
    """Matches RemoveArgument.forward. ling_vec / tokenized_sents* are unused.

    1-D inputs (single sample) -> shape (2,); 2-D batches -> shape (B, 2).
    """
    del ling_vec, tokenized_sents1, tokenized_sents2
    if cat_vec.ndim == 1:
        return _single_call(cat_vec, issue_emb, prepared_params)
    return _batched_call(cat_vec, issue_emb, prepared_params)


# ----------------------------------------------------------------------------
# Pure-JAX reference (unfolded, layer by layer — mirrors the PyTorch graph)
# ----------------------------------------------------------------------------
def reference_forward(cat_vec, issue_emb, params):
    (wc, bc, wi, bi, wcls, bcls, w2, b2, w3, b3) = params
    cat_rep = cat_vec @ wc + bc
    issue_rep = issue_emb @ wi + bi
    cls = jnp.concatenate([cat_rep, issue_rep]) @ wcls + bcls
    cls = cls @ w2 + b2
    return cls @ w3 + b3


if __name__ == "__main__":
    key = jax.random.PRNGKey(0)
    kp, k1, k2, k3, k4, k5, k6, k7 = jax.random.split(key, 8)

    params = init_params(kp)
    prepared = prepare_params(params)          # one-time fold (tiny, ~17 KiB result)

    # --- single-sample call (plain-XLA fast path), matching the PyTorch sig --
    cat_vec = jax.random.normal(k1, (CAT_DIM,), jnp.float32)
    ling_vec = jax.random.normal(k2, (12,), jnp.float32)        # unused
    issue_emb = jax.random.normal(k3, (ISSUE_DIM,), jnp.float32)
    tokenized_sents1 = jnp.zeros((2, 8), jnp.int32)             # unused
    tokenized_sents2 = jnp.zeros((2, 8), jnp.int32)             # unused

    pred = remove_argument_forward(cat_vec, ling_vec, tokenized_sents1,
                                   tokenized_sents2, issue_emb, prepared)
    pred = jax.block_until_ready(pred)
    ref = reference_forward(cat_vec, issue_emb, params)
    assert pred.shape == (OUT,)
    assert jnp.allclose(pred, ref, atol=1e-4, rtol=1e-4), (pred, ref)

    # --- batched call through the Pallas kernel (even batch) ----------------
    B = 16
    cat_b = jax.random.normal(k4, (B, CAT_DIM), jnp.float32)
    issue_b = jax.random.normal(k5, (B, ISSUE_DIM), jnp.float32)
    pred_b = remove_argument_forward(cat_b, ling_vec, tokenized_sents1,
                                     tokenized_sents2, issue_b, prepared)
    pred_b = jax.block_until_ready(pred_b)
    ref_b = jax.vmap(lambda c, i: reference_forward(c, i, params))(cat_b, issue_b)
    assert pred_b.shape == (B, OUT)
    assert jnp.allclose(pred_b, ref_b, atol=1e-4, rtol=1e-4), (pred_b, ref_b)

    # --- ragged batch (exercises the no-pad partial-block masking path) -----
    Br = 13
    cat_r = jax.random.normal(k6, (Br, CAT_DIM), jnp.float32)
    issue_r = jax.random.normal(k7, (Br, ISSUE_DIM), jnp.float32)
    pred_r = remove_argument_forward(cat_r, ling_vec, tokenized_sents1,
                                     tokenized_sents2, issue_r, prepared)
    pred_r = jax.block_until_ready(pred_r)
    ref_r = jax.vmap(lambda c, i: reference_forward(c, i, params))(cat_r, issue_r)
    assert pred_r.shape == (Br, OUT)
    assert jnp.allclose(pred_r, ref_r, atol=1e-4, rtol=1e-4), (pred_r, ref_r)

    print("KERNEL_OK")
</pallas_src>

<mosaic_0001>
module attributes {stable_mosaic.version = 11 : i64} {
  func.func @remove_argument_kernel(%arg0: i32, %arg1: memref<8x542xf32, #tpu.memory_space<vmem>>, %arg2: memref<8x10xf32, #tpu.memory_space<vmem>>, %arg3: memref<542x8xf32, #tpu.memory_space<vmem>>, %arg4: memref<10x8xf32, #tpu.memory_space<vmem>>, %arg5: memref<1x8xf32, #tpu.memory_space<vmem>>, %arg6: memref<8x8xf32, #tpu.memory_space<vmem>>) attributes {dimension_semantics = [#tpu.dimension_semantics<parallel>], iteration_bounds = array<i64: 2>, scalar_prefetch = 0 : i64, scratch_operands = 0 : i64, tpu.core_type = #tpu.core_type<tc>, window_params = [{transform_indices = @transform_0, window_bounds = array<i64: 8, 542>}, {transform_indices = @transform_1, window_bounds = array<i64: 8, 10>}, {pipeline_mode = #tpu.pipeline_mode<synchronous>, transform_indices = @transform_2, window_bounds = array<i64: 542, 8>}, {pipeline_mode = #tpu.pipeline_mode<synchronous>, transform_indices = @transform_3, window_bounds = array<i64: 10, 8>}, {pipeline_mode = #tpu.pipeline_mode<synchronous>, transform_indices = @transform_4, window_bounds = array<i64: 1, 8>}, {transform_indices = @transform_5, window_bounds = array<i64: 8, 8>}]} {
    %c0 = arith.constant 0 : index
    %c0_0 = arith.constant 0 : index
    %0 = vector.load %arg1[%c0, %c0_0] : memref<8x542xf32, #tpu.memory_space<vmem>>, vector<8x542xf32>
    %c0_1 = arith.constant 0 : index
    %c0_2 = arith.constant 0 : index
    %1 = vector.load %arg3[%c0_1, %c0_2] : memref<542x8xf32, #tpu.memory_space<vmem>>, vector<542x8xf32>
    %cst = arith.constant dense<0.000000e+00> : vector<8x8xf32>
    %2 = tpu.matmul %0, %1, %cst {dimension_numbers = #tpu.dot_dimension_numbers<[1], [0], [0], [1], [0, 0, 1, 1], [], []>} : vector<8x542xf32>, vector<542x8xf32>, vector<8x8xf32> -> vector<8x8xf32>
    %c0_3 = arith.constant 0 : index
    %c0_4 = arith.constant 0 : index
    %3 = vector.load %arg2[%c0_3, %c0_4] : memref<8x10xf32, #tpu.memory_space<vmem>>, vector<8x10xf32>
    %c0_5 = arith.constant 0 : index
    %c0_6 = arith.constant 0 : index
    %4 = vector.load %arg4[%c0_5, %c0_6] : memref<10x8xf32, #tpu.memory_space<vmem>>, vector<10x8xf32>
    %cst_7 = arith.constant dense<0.000000e+00> : vector<8x8xf32>
    %5 = tpu.matmul %3, %4, %cst_7 {dimension_numbers = #tpu.dot_dimension_numbers<[1], [0], [0], [1], [0, 0, 1, 1], [], []>} : vector<8x10xf32>, vector<10x8xf32>, vector<8x8xf32> -> vector<8x8xf32>
    %6 = arith.addf %2, %5 : vector<8x8xf32>
    %c0_8 = arith.constant 0 : index
    %c0_9 = arith.constant 0 : index
    %7 = vector.load %arg5[%c0_8, %c0_9] : memref<1x8xf32, #tpu.memory_space<vmem>>, vector<1x8xf32>
    %8 = vector.broadcast %7 : vector<1x8xf32> to vector<8x8xf32>
    %9 = arith.addf %6, %8 : vector<8x8xf32>
    %c0_10 = arith.constant 0 : index
    %c0_11 = arith.constant 0 : index
    %10 = vector.load %arg6[%c0_10, %c0_11] : memref<8x8xf32, #tpu.memory_space<vmem>>, vector<8x8xf32>
    tpu.vector_store %arg6[%c0_10, %c0_11], %9 {strides = array<i32>} : memref<8x8xf32, #tpu.memory_space<vmem>>, vector<8x8xf32>,
    return
  }
  func.func @transform_0(%arg0: i32) -> (i32, i32) {
    %c0_i32 = arith.constant 0 : i32
    %c0_i32_0 = arith.constant 0 : i32
    return %arg0, %c0_i32 : i32, i32
  }
  func.func @transform_1(%arg0: i32) -> (i32, i32) {
    %c0_i32 = arith.constant 0 : i32
    %c0_i32_0 = arith.constant 0 : i32
    return %arg0, %c0_i32 : i32, i32
  }
  func.func @transform_2(%arg0: i32) -> (i32, i32) {
    %c0_i32 = arith.constant 0 : i32
    %c0_i32_0 = arith.constant 0 : i32
    %c0_i32_1 = arith.constant 0 : i32
    return %c0_i32, %c0_i32_0 : i32, i32
  }
  func.func @transform_3(%arg0: i32) -> (i32, i32) {
    %c0_i32 = arith.constant 0 : i32
    %c0_i32_0 = arith.constant 0 : i32
    %c0_i32_1 = arith.constant 0 : i32
    return %c0_i32, %c0_i32_0 : i32, i32
  }
  func.func @transform_4(%arg0: i32) -> (i32, i32) {
    %c0_i32 = arith.constant 0 : i32
    %c0_i32_0 = arith.constant 0 : i32
    %c0_i32_1 = arith.constant 0 : i32
    return %c0_i32, %c0_i32_0 : i32, i32
  }
  func.func @transform_5(%arg0: i32) -> (i32, i32) {
    %c0_i32 = arith.constant 0 : i32
    %c0_i32_0 = arith.constant 0 : i32
    return %arg0, %c0_i32 : i32, i32
  }
}

</mosaic_0001>

<bundles_post_ra>
// kernel: tpu_custom_call.1
= control target key start
LH: loop header
LB: loop body
LE: loop exit
PB: predicated region body
PF: predicated region fallthrough
CT: control target
= control target key end

     0   :  { %s928_s18 = smov 0   ;;  %s1186_s0 = inlined_call_operand.vmem [shape: f32[16,542], index: 0, kind: input, shape index: {}]   ;;  %s1187_s1 = inlined_call_operand.vmem [shape: f32[16,10], index: 1, kind: input, shape index: {}]   ;;  %s1188_s2 = inlined_call_operand.vmem [shape: f32[542,8], index: 2, kind: input, shape index: {}]   ;;  %s1189_s3 = inlined_call_operand.vmem [shape: f32[10,8], index: 3, kind: input, shape index: {}]   ;;  %s1190_s4 = inlined_call_operand.vmem [shape: f32[1,8], index: 4, kind: input, shape index: {}]   ;;  %s1191_s5 = inlined_call_operand.vmem [shape: f32[16,8], index: 5, kind: output, shape index: {}]  }
   0x1 LB: > { %s687_s19 = sadd.s32 4294967295, %s892_s18   ;;  %p691_p0 = scmp.ge.s32.totalorder %s892_s18, 1  ;;  %s892_s18 = sphi %s928_s18, %s15_s18  }
   0x2   : > { %p196_p1 = scmp.lt.s32.totalorder %s892_s18, 3 }
   0x4   : > { %p197_p2 = pnand %p691_p0, %p196_p1 }
   0x5   : > { %v314_v0 = vld [vmem:[%s1189_s3] sm:$0xff] (!%p197_p2)  ;;  %v315_v1 = vld [vmem:[%s1189_s3 + $0x8] sm:$0x3] (!%p197_p2)  ;;  %vm320_vm0 = vcmask (!%p197_p2), 1041408   ;;  %v894_v2 = vmov (!%p197_p2), 0.0|0.0   ;;  %vm895_vm1 = vmmov (!%p197_p2), 1  }
   0x6   : > { %200 = sbr.rel (%p197_p2) target bundleno = 271 (0x10f), region = 40  ;;  %798 = vmatprep.subr.bf16.mxu0 (!%p197_p2), %v894_v2  ;;  %v799_v3 = vpack.c.bf16 (!%p197_p2), %v315_v1, %v314_v0  ;;  %vm800_vm2 = vmpackc.low (!%p197_p2), %vm320_vm0, %vm895_vm1  ;;  %v261_v4 = vld [vmem:[%s1188_s2 + $0x80] sm:$0xff] (!%p197_p2)  ;;  %v262_v5 = vld [vmem:[%s1188_s2 + $0x88] sm:$0xff] (!%p197_p2)  ;;  %p227_p3 = scmp.lt.s32.totalorder (!%p197_p2), %s687_s19, 1  ;;  %vm896_vm3 = vmmov (!%p197_p2), 0   ;;  %v897_v9 = vmov (!%p197_p2), 0.0  }
   0x7   : > { %v802_v6 = vpack.c.bf16 (!%p197_p2), %v262_v5, %v261_v4  ;;  %v245_v7 = vld [vmem:[%s1188_s2] sm:$0xff] (!%p197_p2)  ;;  %v246_v8 = vld [vmem:[%s1188_s2 + $0x8] sm:$0xff] (!%p197_p2)  ;;  %784 = vmatprep.mubr.msk.f32.mxu0 (!%p197_p2), %vm896_vm3, %v897_v9  ;;  %v263_v13 = vld [vmem:[%s1188_s2 + $0x90] sm:$0xff] (!%p197_p2)  ;;  %vm316_vm4 = vcmask (!%p197_p2), 80896   ;;  %vm398_vm5 = vcmask (!%p197_p2), 1045504   ;;  %vm394_vm7 = vcmask (!%p197_p2), 244736  }
   0x8   : > { %801 = vmatpush3.bf16.msk.msra.mxu0 (!%p197_p2), %vm800_vm2, %v799_v3  ;;  %v804_v10 = vpack.c.bf16 (!%p197_p2), %v246_v8, %v245_v7  ;;  %v293_v11 = vld [vmem:[%s1188_s2 + $0x180] sm:$0xff] (!%p197_p2)  ;;  %v294_v12 = vld [vmem:[%s1188_s2 + $0x188] sm:$0xff] (!%p197_p2)  ;;  %v264_v15 = vld [vmem:[%s1188_s2 + $0x98] sm:$0xff] (!%p197_p2)  ;;  %vm620_vm8 = vcmask (!%p197_p2), 64512  }
   0x9   : > { %803 = vmatprep.subr.bf16.mxu1 (!%p197_p2), %v802_v6  ;;  %v834_v14 = vpack.c.bf16 (!%p197_p2), %v294_v12, %v293_v11  ;;  %v277_v16 = vld [vmem:[%s1188_s2 + $0x100] sm:$0xff] (!%p197_p2)  ;;  %v278_v17 = vld [vmem:[%s1188_s2 + $0x108] sm:$0xff] (!%p197_p2)  ;;  %v806_v18 = vpack.c.bf16 (!%p197_p2), %v264_v15, %v263_v13  ;;  %v247_v20 = vld [vmem:[%s1188_s2 + $0x10] sm:$0xff] (!%p197_p2) }
   0xa   : > { %805 = vmatpush3.bf16.msra.mxu1 (!%p197_p2), %v804_v10  ;;  %v836_v19 = vpack.c.bf16 (!%p197_p2), %v278_v17, %v277_v16  ;;  %v248_v21 = vld [vmem:[%s1188_s2 + $0x18] sm:$0xff] (!%p197_p2)  ;;  %v295_v22 = vld [vmem:[%s1188_s2 + $0x190] sm:$0xff] (!%p197_p2)  ;;  %v265_v25 = vld [vmem:[%s1188_s2 + $0xa0] sm:$0xff] (!%p197_p2) }
   0xb   : > { %835 = vmatprep.subr.bf16.mxu0 (!%p197_p2), %v834_v14  ;;  %v808_v23 = vpack.c.bf16 (!%p197_p2), %v248_v21, %v247_v20  ;;  %v296_v24 = vld [vmem:[%s1188_s2 + $0x198] sm:$0xff] (!%p197_p2)  ;;  %v266_v26 = vld [vmem:[%s1188_s2 + $0xa8] sm:$0xff] (!%p197_p2)  ;;  %807 = vmatprep.subr.bf16.mxu1 (!%p197_p2), %v806_v18  ;;  %v279_v30 = vld [vmem:[%s1188_s2 + $0x110] sm:$0xff] (!%p197_p2) }
   0xc   : > { %v838_v28 = vpack.c.bf16 (!%p197_p2), %v296_v24, %v295_v22  ;;  %v810_v29 = vpack.c.bf16 (!%p197_p2), %v266_v26, %v265_v25  ;;  %v280_v31 = vld [vmem:[%s1188_s2 + $0x118] sm:$0xff] (!%p197_p2)  ;;  %v249_v32 = vld [vmem:[%s1188_s2 + $0x20] sm:$0xff] (!%p197_p2)  ;;  %v250_v33 = vld [vmem:[%s1188_s2 + $0x28] sm:$0xff] (!%p197_p2) }
   0xd   : > { %s1193_s19 = smov (!%p227_p3, %s687_s19), 1  ;;  %v297_v34 = vld [vmem:[%s1188_s2 + $0x1a0] sm:$0xff]  ;;  %v840_v35 = vpack.c.bf16 %v280_v31, %v279_v30  ;;  %v812_v36 = vpack.c.bf16 %v250_v33, %v249_v32  ;;  %v298_v37 = vld [vmem:[%s1188_s2 + $0x1a8] sm:$0xff]  ;;  %v267_v38 = vld [vmem:[%s1188_s2 + $0xb0] sm:$0xff] }
   0xe   : > { %s693_s21 = sshll.u32 %s1193_s19, 3  ;;  %809 = vmatpush3.bf16.msra.mxu1 %v808_v23  ;;  %v268_v39 = vld [vmem:[%s1188_s2 + $0xb8] sm:$0xff]  ;;  %v842_v40 = vpack.c.bf16 %v298_v37, %v297_v34  ;;  %v281_v42 = vld [vmem:[%s1188_s2 + $0x120] sm:$0xff]  ;;  %v282_v43 = vld [vmem:[%s1188_s2 + $0x128] sm:$0xff]  ;;  %s873_s16 = smul.u32 40, %s1193_s19 }
   0xf   : > { %s235_s30 = scalar_lea.vmem %s1187_s1, %s693_s21  ;;  %811 = vmatprep.subr.bf16.mxu1 %v810_v29  ;;  %v814_v41 = vpack.c.bf16 %v268_v39, %v267_v38  ;;  %v251_v44 = vld [vmem:[%s1188_s2 + $0x30] sm:$0xff]  ;;  %v252_v45 = vld [vmem:[%s1188_s2 + $0x38] sm:$0xff]  ;;  %v269_v48 = vld [vmem:[%s1188_s2 + $0xc0] sm:$0xff]  ;;  %v844_v50 = vpack.c.bf16 %v282_v43, %v281_v42  ;;  %s239_s15 = scalar_lea.vmem %s1191_s5, %s693_s21 }
  0x10   : > { %v313_v27 = vld [vmem:[%s235_s30] sm:$0xff]  ;;  %v299_v46 = vld [vmem:[%s1188_s2 + $0x1b0] sm:$0xff]  ;;  %v300_v47 = vld [vmem:[%s1188_s2 + $0x1b8] sm:$0xff]  ;;  %v816_v51 = vpack.c.bf16 %v252_v45, %v251_v44  ;;  %s1103_s13 = scalar_lea.vmem %s1186_s0, %s873_s16 }
  0x11   : > { %785 = vmatmul.mubr.msk.f32.vlgmr.msra.gmra.mrb[0].mxu0 %vm316_vm4, %v313_v27  ;;  %v270_v49 = vld [vmem:[%s1188_s2 + $0xc8] sm:$0xff]  ;;  %v283_v52 = vld [vmem:[%s1188_s2 + $0x130] sm:$0xff]  ;;  %v284_v53 = vld [vmem:[%s1188_s2 + $0x138] sm:$0xff]  ;;  %v846_v54 = vpack.c.bf16 %v300_v47, %v299_v46 }
  0x12   : > { %837 = vmatpush3.bf16.msra.mxu0 %v836_v19  ;;  %813 = vmatpush3.bf16.msra.mxu1 %v812_v36  ;;  %v818_v55 = vpack.c.bf16 %v270_v49, %v269_v48  ;;  %v253_v56 = vld [vmem:[%s1188_s2 + $0x40] sm:$0xff]  ;;  %v254_v57 = vld [vmem:[%s1188_s2 + $0x48] sm:$0xff]  ;;  %v271_v60 = vld [vmem:[%s1188_s2 + $0xd0] sm:$0xff]  ;;  %v848_v62 = vpack.c.bf16 %v284_v53, %v283_v52 }
  0x13   : > { %839 = vmatprep.subr.bf16.mxu0 %v838_v28  ;;  %815 = vmatprep.subr.bf16.mxu1 %v814_v41  ;;  %v301_v58 = vld [vmem:[%s1188_s2 + $0x1c0] sm:$0xff]  ;;  %v302_v59 = vld [vmem:[%s1188_s2 + $0x1c8] sm:$0xff]  ;;  %v272_v61 = vld [vmem:[%s1188_s2 + $0xd8] sm:$0xff]  ;;  %v820_v63 = vpack.c.bf16 %v254_v57, %v253_v56 }
  0x14   : > { %v285_v0 = vld [vmem:[%s1188_s2 + $0x140] sm:$0xff]  ;;  %v286_v1 = vld [vmem:[%s1188_s2 + $0x148] sm:$0xff]  ;;  %v850_v3 = vpack.c.bf16 %v302_v59, %v301_v58  ;;  %v822_v4 = vpack.c.bf16 %v272_v61, %v271_v60  ;;  %v255_v5 = vld [vmem:[%s1188_s2 + $0x50] sm:$0xff] }
  0x15   : > { %v256_v6 = vld [vmem:[%s1188_s2 + $0x58] sm:$0xff]  ;;  %v303_v7 = vld [vmem:[%s1188_s2 + $0x1d0] sm:$0xff]  ;;  %v273_v10 = vld [vmem:[%s1188_s2 + $0xe0] sm:$0xff]  ;;  %v852_v12 = vpack.c.bf16 %v286_v1, %v285_v0 }
  0x16   : > { %841 = vmatpush3.bf16.msra.mxu0 %v840_v35  ;;  %817 = vmatpush3.bf16.msra.mxu1 %v816_v51  ;;  %v304_v8 = vld [vmem:[%s1188_s2 + $0x1d8] sm:$0xff]  ;;  %v274_v11 = vld [vmem:[%s1188_s2 + $0xe8] sm:$0xff]  ;;  %v824_v13 = vpack.c.bf16 %v256_v6, %v255_v5  ;;  %v287_v14 = vld [vmem:[%s1188_s2 + $0x150] sm:$0xff] }
  0x17   : > { %843 = vmatprep.subr.bf16.mxu0 %v842_v40  ;;  %819 = vmatprep.subr.bf16.mxu1 %v818_v55  ;;  %v288_v15 = vld [vmem:[%s1188_s2 + $0x158] sm:$0xff]  ;;  %v257_v16 = vld [vmem:[%s1188_s2 + $0x60] sm:$0xff]  ;;  %v854_v17 = vpack.c.bf16 %v304_v8, %v303_v7  ;;  %v826_v18 = vpack.c.bf16 %v274_v11, %v273_v10  ;;  %v258_v19 = vld [vmem:[%s1188_s2 + $0x68] sm:$0xff] }
  0x18   : > { %v305_v20 = vld [vmem:[%s1188_s2 + $0x1e0] sm:$0xff]  ;;  %v241_v21 = vld [vmem:[%s1103_s13 + $0x8] sm:$0xff]  ;;  %v275_v23 = vld [vmem:[%s1188_s2 + $0xf0] sm:$0xff]  ;;  %v856_v26 = vpack.c.bf16 %v288_v15, %v287_v14  ;;  %v828_v27 = vpack.c.bf16 %v258_v19, %v257_v16 }
  0x19   : > { %v306_v22 = vld [vmem:[%s1188_s2 + $0x1e8] sm:$0xff]  ;;  %v276_v24 = vld [vmem:[%s1188_s2 + $0xf8] sm:$0xff]  ;;  %466 = vmatprep.mubr.f32.mxu1 %v241_v21  ;;  %v289_v28 = vld [vmem:[%s1188_s2 + $0x160] sm:$0xff] }
  0x1a   : > { %845 = vmatpush3.bf16.msra.mxu0 %v844_v50  ;;  %821 = vmatpush3.bf16.msra.mxu1 %v820_v63  ;;  %v243_v25 = vld [vmem:[%s1103_s13 + $0x18] sm:$0xff]  ;;  %v858_v29 = vpack.c.bf16 %v306_v22, %v305_v20  ;;  %v830_v30 = vpack.c.bf16 %v276_v24, %v275_v23  ;;  %v290_v31 = vld [vmem:[%s1188_s2 + $0x168] sm:$0xff]  ;;  %v259_v32 = vld [vmem:[%s1188_s2 + $0x70] sm:$0xff] }
  0x1b   : > { %847 = vmatprep.subr.bf16.mxu0 %v846_v54  ;;  %823 = vmatprep.subr.bf16.mxu1 %v822_v4  ;;  %v260_v33 = vld [vmem:[%s1188_s2 + $0x78] sm:$0xff]  ;;  %v307_v34 = vld [vmem:[%s1188_s2 + $0x1f0] sm:$0xff]  ;;  %v860_v36 = vpack.c.bf16 %v290_v31, %v289_v28  ;;  %v309_v41 = vld [vmem:[%s1188_s2 + $0x200] sm:$0xff] }
  0x1c   : > { %v308_v35 = vld [vmem:[%s1188_s2 + $0x1f8] sm:$0xff]  ;;  %536 = vmatprep.mubr.f32.mxu0 %v243_v25  ;;  %v832_v37 = vpack.c.bf16 %v260_v33, %v259_v32  ;;  %v291_v38 = vld [vmem:[%s1188_s2 + $0x170] sm:$0xff]  ;;  %v310_v42 = vld [vmem:[%s1188_s2 + $0x208] sm:$0xff] }
  0x1d   : > { %v862_v39 = vpack.c.bf16 %v308_v35, %v307_v34  ;;  %v292_v40 = vld [vmem:[%s1188_s2 + $0x178] sm:$0xff]  ;;  %v240_v43 = vld [vmem:[%s1103_s13] sm:$0xff]  ;;  %v867_v45 = vpack.c.bf16 %v310_v42, %v309_v41  ;;  %v311_v46 = vld [vmem:[%s1188_s2 + $0x210] sm:$0xff] }
  0x1e   : > { %849 = vmatpush3.bf16.msra.mxu0 %v848_v62  ;;  %825 = vmatpush3.bf16.msra.mxu1 %v824_v13  ;;  %v864_v44 = vpack.c.bf16 %v292_v40, %v291_v38  ;;  %v312_v47 = vld [vmem:[%s1188_s2 + $0x218] sm:$0x3f]  ;;  %v242_v48 = vld [vmem:[%s1103_s13 + $0x10] sm:$0xff]  ;;  %vm871_vm6 = vmpackc.low %vm398_vm5, %vm895_vm1 }
  0x1f   : > { %851 = vmatprep.subr.bf16.mxu0 %v850_v3  ;;  %827 = vmatprep.subr.bf16.mxu1 %v826_v18  ;;  %v870_v49 = vpack.c.bf16 %v312_v47, %v311_v46  ;;  %v244_v50 = vld [vmem:[%s1103_s13 + $0x20] sm:$0xff] }
  0x22   : > { %853 = vmatpush3.bf16.msra.mxu0 %v852_v12  ;;  %829 = vmatpush3.bf16.msra.mxu1 %v828_v27 }
  0x23   : > { %855 = vmatprep.subr.bf16.mxu0 %v854_v17  ;;  %831 = vmatprep.subr.bf16.mxu1 %v830_v30 }
  0x26   : > { %857 = vmatpush3.bf16.msra.mxu0 %v856_v26  ;;  %833 = vmatpush3.bf16.msra.mxu1 %v832_v37 }
  0x27   : > { %859 = vmatprep.subr.bf16.mxu0 %v858_v29  ;;  %866 = vmatprep.subr.bf16.mxu1 %v894_v2 }
  0x29   : > { %467 = vmatmul.mubr.f32.vlgmr.msra.gmra.mrb[0].mxu1 %v240_v43 }
  0x2a   : > { %861 = vmatpush3.bf16.msra.mxu0 %v860_v36  ;;  %868 = vmatpush3.bf16.msra.mxu1 %v867_v45 }
  0x2b   : > { %863 = vmatprep.subr.bf16.mxu0 %v862_v39  ;;  %869 = vmatprep.subr.bf16.mxu1 %v894_v2 }
  0x2c   : > { %795 = vmatprep.mubr.msk.f32.mxu1 %vm896_vm3, %v897_v9  ;;  %v699_v9 = vld [vmem:[%s1190_s4] ss:$0 sm:$0xff] }
  0x2e   : > { %865 = vmatpush3.bf16.msra.mxu0 %v864_v44  ;;  %872 = vmatpush3.bf16.msk.msra.mxu1 %vm871_vm6, %v870_v49 }
  0x31   : > { %537 = vmatmul.mubr.f32.vlgmr.msra.gmra.mrb[2].mxu0 %v242_v48  ;;  %796 = vmatmul.mubr.msk.f32.vlgmr.msra.gmra.mrb[2].mxu1 %vm394_vm7, %v244_v50 }
  0xe4   : > { %v390_v51 = vpop.f32.mrb[0].mxu0 }
  0xe5   : > { %v786_v52 = vpop.f32.mrb[1].mxu0 }
  0xfc   : > { %v737_v53 = vpop.f32.mrb[0].mxu1 }
  0xfd   : > { %v738_v54 = vpop.f32.mrb[1].mxu1 }
  0xfe   : > { %v739_v55 = vadd.f32 %v738_v54, %v737_v53 }
 0x100   : > { %v469_v56 = vadd.f32 %v739_v55, %v390_v51 }
 0x104   : > { %v772_v57 = vpop.f32.mrb[2].mxu0  ;;  %v608_v2 = vpop.f32.mrb[2].mxu1 }
 0x105   : > { %v773_v58 = vpop.f32.mrb[3].mxu0  ;;  %v797_v61 = vpop.f32.mrb[3].mxu1 }
 0x106   : > { %v774_v59 = vadd.f32 %v773_v58, %v772_v57 }
 0x108   : > { %v539_v60 = vadd.f32 %v774_v59, %v469_v56 }
 0x10a   : > { %v609_v62 = vadd.f32 %v608_v2, %v539_v60 }
 0x10c   : > { %v619_v63 = vadd.f32 %v699_v9, %v609_v62 }
 0x10e   : > { %621 = vst.msk [vmem:[%s239_s15] sm:$0xff] %vm620_vm8, %v619_v63 }
 0x10f PF: > { %s15_s18 = sadd.s32 1, %s892_s18  }
 0x110   : > { %p12_p4 = scmp.ge.s32.totalorder %s15_s18, 4  }
 0x112   :  { %14 = sbr.rel (!%p12_p4) target bundleno = 1 (0x1), region = 73 }

</bundles_post_ra>
